<compile_context>
chip_gen: v6e
topology: v6e:2x2x1
jax: 0.10.0
libtpu: 0.0.40
codegen_flags: <defaults>
</compile_context>

<pallas_src>
import functools

import jax
import jax.numpy as jnp
from jax.experimental import pallas as pl
from jax.experimental.pallas import tpu as pltpu


def _autoencoder_kernel(x_ref, w1_ref, b1_ref, w2_ref, b2_ref, o_ref, *,
                        approx_sigmoid=False):
    """One fused step: encoder matmul + sigmoid, decoder matmul + sigmoid.

    Matmuls accumulate in f32 on the MXU; bias-add + sigmoid run in f32 on the
    VPU/EUP; the intermediate z stays in vregs/VMEM (no HBM round trip).
    """
    # Cast x to the weights' compute dtype here (fused), not in the wrapper.
    xv = x_ref[...].astype(w1_ref.dtype)
    h = jnp.dot(xv, w1_ref[...], preferred_element_type=jnp.float32)
    z = jax.nn.sigmoid(h + b1_ref[...])                     # f32 bias + sigmoid
    y = jnp.dot(z.astype(w2_ref.dtype), w2_ref[...],
                preferred_element_type=jnp.float32)
    y = y + b2_ref[...]
    if approx_sigmoid:
        # Decoder epilogue over (tb, D): exp and approx reciprocal both ride the
        # EUP slot, keeping the VALU free (mainly helps v5e's f32-only VPU).
        o_ref[...] = pl.reciprocal(1.0 + jnp.exp(-y), approx=True).astype(o_ref.dtype)
    else:
        o_ref[...] = jax.nn.sigmoid(y).astype(o_ref.dtype)


def _round_up(n, m):
    return ((n + m - 1) // m) * m


def _pick_batch_tile(B):
    """Batch tile giving >= 2 'parallel' grid steps whenever B >= 16."""
    if B < 16:
        return B                       # single fused step; tile == full extent
    if B >= 1024:
        return 512                     # MXU-dense tiles, >= 2 steps
    if B >= 256:
        return 128
    return _round_up(pl.cdiv(B, 2), 8)  # ~B//2, sublane-aligned → 2 steps


def prepare_params(enc_weight, enc_bias, dec_weight, dec_bias, *, weight_dtype=None):
    """Transpose PyTorch (out, in) weights to (in, out) and cast ONCE at init.

    Store weights in bf16 (weight_dtype=jnp.bfloat16) to halve weight DMA on
    v5e/v6e/v7x; biases stay f32 (sigmoid/bias math runs in f32 in-kernel).
    """
    w1 = jnp.asarray(enc_weight).T
    w2 = jnp.asarray(dec_weight).T
    if weight_dtype is not None:
        w1 = w1.astype(weight_dtype)
        w2 = w2.astype(weight_dtype)
    b1 = jnp.asarray(enc_bias, jnp.float32).reshape(1, -1)
    b2 = jnp.asarray(dec_bias, jnp.float32).reshape(1, -1)
    return w1, b1, w2, b2


def autoencoder1_forward(x, w1, b1, w2, b2, *, out_dtype=None, batch_tile=None,
                         approx_sigmoid=False):
    """Forward pass of Autoencoder1.

    Args:
      x:  (B, D) input (kept in its own dtype in HBM; cast in-kernel).
      w1: (D, h1)  == enc.weight.T, in the desired compute dtype (f32/bf16).
      b1: (h1,) or (1, h1) bias (used in f32).
      w2: (h1, D)  == dec.weight.T, compute dtype.
      b2: (D,) or (1, D) bias (used in f32).
      out_dtype: output dtype (default: x.dtype). Pass bf16 to halve writeback.
      batch_tile: optional batch-tile override (multiple of 8, or == B).
      approx_sigmoid: use EUP approx-reciprocal for the decoder sigmoid.
    """
    B, D = x.shape
    h1 = w1.shape[1]
    out_dtype = x.dtype if out_dtype is None else jnp.dtype(out_dtype)

    # Biases in f32, shaped (1, N) so the kernel sees 2-D lane-dense tiles.
    b1 = jnp.asarray(b1, jnp.float32).reshape(1, h1)
    b2 = jnp.asarray(b2, jnp.float32).reshape(1, D)

    # ---- batch tiling ----
    if batch_tile is not None:
        tb = int(batch_tile)
        if tb != B and tb % 8 != 0:
            raise ValueError("batch_tile must be a multiple of 8 or equal to B")
    else:
        tb = _pick_batch_tile(B)
    padded_B = _round_up(B, tb)
    num_steps = padded_B // tb
    if padded_B != B:
        # Ragged batch: pad rather than a single giant un-pipelined step.
        # (One extra HBM pass over x; only taken for non-divisible batch sizes.)
        x = jnp.pad(x, ((0, padded_B - B), (0, 0)))

    # ---- VMEM budget ----
    # Weights/biases are resident (single copy); x/out tiles are double-buffered;
    # f32 intermediates (h, z, y) live in vregs/VMEM.
    wbytes = jnp.dtype(w1.dtype).itemsize
    xbytes = jnp.dtype(x.dtype).itemsize
    obytes = jnp.dtype(out_dtype).itemsize
    approx_vmem = (
        2 * D * h1 * wbytes + (h1 + D) * 4            # resident W1/W2 + biases
        + 2 * tb * D * (xbytes + obytes)              # double-buffered x / out tiles
        + tb * (h1 + D) * 4                           # f32 intermediates
        + (2 << 20)                                   # headroom
    )
    vmem_limit = None
    if approx_vmem > (32 << 20):                      # default scoped limit
        try:
            info = pltpu.get_tpu_info()
            phys = int(getattr(info, "vmem_capacity_bytes", 64 << 20))
        except Exception:
            phys = 64 << 20                           # conservative: v7x per-TC
        ceiling = max(phys - (8 << 20), 32 << 20)     # leave compiler headroom
        vmem_limit = int(min(approx_vmem, ceiling))

    kernel = functools.partial(_autoencoder_kernel, approx_sigmoid=approx_sigmoid)

    def _build(single_buffer_consts):
        def const_spec(shape):
            # Grid-invariant operands: keep one resident VMEM buffer instead of
            # double-buffering constants when there are multiple grid steps.
            if single_buffer_consts and num_steps > 1:
                return pl.BlockSpec(shape, lambda i: (0, 0),
                                    pipeline_mode=pl.Buffered(1))
            return pl.BlockSpec(shape, lambda i: (0, 0))

        return pl.pallas_call(
            kernel,
            out_shape=jax.ShapeDtypeStruct((padded_B, D), out_dtype),
            grid_spec=pltpu.PrefetchScalarGridSpec(
                num_scalar_prefetch=0,
                grid=(num_steps,),
                in_specs=[
                    pl.BlockSpec((tb, D), lambda i: (i, 0)),  # x batch tile
                    const_spec((D, h1)),                      # W1 (resident)
                    const_spec((1, h1)),                      # b1
                    const_spec((h1, D)),                      # W2 (resident)
                    const_spec((1, D)),                       # b2
                ],
                out_specs=pl.BlockSpec((tb, D), lambda i: (i, 0)),
            ),
            compiler_params=pltpu.CompilerParams(
                dimension_semantics=("parallel",),   # batch axis: megacore-shardable
                vmem_limit_bytes=vmem_limit,
            ),
        )

    try:
        out = _build(True)(x, w1, b1, w2, b2)
    except Exception:
        # Fallback for jax versions that reject Buffered(1): the constant
        # index_map still avoids re-fetching weights; it just keeps 2 buffers.
        out = _build(False)(x, w1, b1, w2, b2)

    if padded_B != B:
        out = out[:B]
    return out


if __name__ == "__main__":
    # Small shapes consistent with the module; D and h1 multiples of 128 so
    # loads/stores stay lane-dense.
    B, D, h1 = 16, 256, 128

    key = jax.random.PRNGKey(0)
    kx, kw1, kb1, kw2, kb2, kx2 = jax.random.split(key, 6)

    x = jax.random.normal(kx, (B, D), dtype=jnp.float32)
    # PyTorch Linear stores W as (out, in); prepare_params transposes/casts once.
    W1_torch = jax.random.normal(kw1, (h1, D), dtype=jnp.float32) * 0.05  # enc.weight
    b1 = jax.random.normal(kb1, (h1,), dtype=jnp.float32) * 0.05          # enc.bias
    W2_torch = jax.random.normal(kw2, (D, h1), dtype=jnp.float32) * 0.05  # dec.weight
    b2 = jax.random.normal(kb2, (D,), dtype=jnp.float32) * 0.05           # dec.bias

    # f32 weights (as stored by the PyTorch module).
    w1f, b1f, w2f, b2f = prepare_params(W1_torch, b1, W2_torch, b2)

    # Plain-JAX reference (same math as the PyTorch forward).
    ref = jax.nn.sigmoid(jax.nn.sigmoid(x @ w1f + b1f) @ w2f + b2f)

    # f32 path: B=16 → 2 "parallel" grid steps of tb=8 (resident weights).
    out = jax.block_until_ready(autoencoder1_forward(x, w1f, b1f, w2f, b2f))
    assert out.shape == (B, D) and out.dtype == x.dtype
    assert jnp.allclose(out, ref, atol=1e-5, rtol=1e-5)

    # bf16-resident weights (cast ONCE at init; x stays f32 in HBM, cast in-kernel).
    w1b, b1b, w2b, b2b = prepare_params(W1_torch, b1, W2_torch, b2,
                                        weight_dtype=jnp.bfloat16)
    out_bf16 = jax.block_until_ready(autoencoder1_forward(x, w1b, b1b, w2b, b2b))
    assert out_bf16.shape == (B, D) and out_bf16.dtype == x.dtype
    assert jnp.allclose(out_bf16, ref, atol=3e-2)

    # Ragged batch (pads to 2 tiles of 16) + approx-sigmoid decoder epilogue.
    x2 = jax.random.normal(kx2, (20, D), dtype=jnp.float32)
    ref2 = jax.nn.sigmoid(jax.nn.sigmoid(x2 @ w1f + b1f) @ w2f + b2f)
    out2 = jax.block_until_ready(
        autoencoder1_forward(x2, w1f, b1f, w2f, b2f, approx_sigmoid=True))
    assert out2.shape == (20, D) and out2.dtype == x2.dtype
    assert jnp.allclose(out2, ref2, atol=1e-2)

    print("KERNEL_OK")
</pallas_src>

<mosaic_0001>
module attributes {stable_mosaic.version = 11 : i64} {
  func.func @_autoencoder_kernel(%arg0: i32, %arg1: memref<8x256xf32, #tpu.memory_space<vmem>>, %arg2: memref<256x128xf32, #tpu.memory_space<vmem>>, %arg3: memref<1x128xf32, #tpu.memory_space<vmem>>, %arg4: memref<128x256xf32, #tpu.memory_space<vmem>>, %arg5: memref<1x256xf32, #tpu.memory_space<vmem>>, %arg6: memref<8x256xf32, #tpu.memory_space<vmem>>) attributes {dimension_semantics = [#tpu.dimension_semantics<parallel>], iteration_bounds = array<i64: 2>, scalar_prefetch = 0 : i64, scratch_operands = 0 : i64, tpu.core_type = #tpu.core_type<tc>, window_params = [{transform_indices = @transform_0, window_bounds = array<i64: 8, 256>}, {pipeline_mode = #tpu.pipeline_mode<synchronous>, transform_indices = @transform_1, window_bounds = array<i64: 256, 128>}, {pipeline_mode = #tpu.pipeline_mode<synchronous>, transform_indices = @transform_2, window_bounds = array<i64: 1, 128>}, {pipeline_mode = #tpu.pipeline_mode<synchronous>, transform_indices = @transform_3, window_bounds = array<i64: 128, 256>}, {pipeline_mode = #tpu.pipeline_mode<synchronous>, transform_indices = @transform_4, window_bounds = array<i64: 1, 256>}, {transform_indices = @transform_5, window_bounds = array<i64: 8, 256>}]} {
    %c0 = arith.constant 0 : index
    %c0_0 = arith.constant 0 : index
    %0 = vector.load %arg1[%c0, %c0_0] : memref<8x256xf32, #tpu.memory_space<vmem>>, vector<8x256xf32>
    %c0_1 = arith.constant 0 : index
    %c0_2 = arith.constant 0 : index
    %1 = vector.load %arg2[%c0_1, %c0_2] : memref<256x128xf32, #tpu.memory_space<vmem>>, vector<256x128xf32>
    %cst = arith.constant dense<0.000000e+00> : vector<8x128xf32>
    %2 = tpu.matmul %0, %1, %cst {dimension_numbers = #tpu.dot_dimension_numbers<[1], [0], [0], [1], [0, 0, 1, 1], [], []>} : vector<8x256xf32>, vector<256x128xf32>, vector<8x128xf32> -> vector<8x128xf32>
    %c0_3 = arith.constant 0 : index
    %c0_4 = arith.constant 0 : index
    %3 = vector.load %arg3[%c0_3, %c0_4] : memref<1x128xf32, #tpu.memory_space<vmem>>, vector<1x128xf32>
    %4 = vector.broadcast %3 : vector<1x128xf32> to vector<8x128xf32>
    %5 = arith.addf %2, %4 : vector<8x128xf32>
    %6 = arith.negf %5 : vector<8x128xf32>
    %7 = math.exp %6 : vector<8x128xf32>
    %cst_5 = arith.constant 1.000000e+00 : f32
    %8 = vector.broadcast %cst_5 : f32 to vector<8x128xf32>
    %9 = arith.addf %8, %7 : vector<8x128xf32>
    %10 = arith.divf %8, %9 : vector<8x128xf32>
    %c0_6 = arith.constant 0 : index
    %c0_7 = arith.constant 0 : index
    %11 = vector.load %arg4[%c0_6, %c0_7] : memref<128x256xf32, #tpu.memory_space<vmem>>, vector<128x256xf32>
    %cst_8 = arith.constant dense<0.000000e+00> : vector<8x256xf32>
    %12 = tpu.matmul %10, %11, %cst_8 {dimension_numbers = #tpu.dot_dimension_numbers<[1], [0], [0], [1], [0, 0, 1, 1], [], []>} : vector<8x128xf32>, vector<128x256xf32>, vector<8x256xf32> -> vector<8x256xf32>
    %c0_9 = arith.constant 0 : index
    %c0_10 = arith.constant 0 : index
    %13 = vector.load %arg5[%c0_9, %c0_10] : memref<1x256xf32, #tpu.memory_space<vmem>>, vector<1x256xf32>
    %14 = vector.broadcast %13 : vector<1x256xf32> to vector<8x256xf32>
    %15 = arith.addf %12, %14 : vector<8x256xf32>
    %16 = arith.negf %15 : vector<8x256xf32>
    %17 = math.exp %16 : vector<8x256xf32>
    %cst_11 = arith.constant 1.000000e+00 : f32
    %18 = vector.broadcast %cst_11 : f32 to vector<8x256xf32>
    %19 = arith.addf %18, %17 : vector<8x256xf32>
    %20 = arith.divf %18, %19 : vector<8x256xf32>
    %c0_12 = arith.constant 0 : index
    %c0_13 = arith.constant 0 : index
    %21 = vector.load %arg6[%c0_12, %c0_13] : memref<8x256xf32, #tpu.memory_space<vmem>>, vector<8x256xf32>
    tpu.vector_store %arg6[%c0_12, %c0_13], %20 {strides = array<i32>} : memref<8x256xf32, #tpu.memory_space<vmem>>, vector<8x256xf32>,
    return
  }
  func.func @transform_0(%arg0: i32) -> (i32, i32) {
    %c0_i32 = arith.constant 0 : i32
    %c0_i32_0 = arith.constant 0 : i32
    return %arg0, %c0_i32 : i32, i32
  }
  func.func @transform_1(%arg0: i32) -> (i32, i32) {
    %c0_i32 = arith.constant 0 : i32
    %c0_i32_0 = arith.constant 0 : i32
    %c0_i32_1 = arith.constant 0 : i32
    return %c0_i32, %c0_i32_0 : i32, i32
  }
  func.func @transform_2(%arg0: i32) -> (i32, i32) {
    %c0_i32 = arith.constant 0 : i32
    %c0_i32_0 = arith.constant 0 : i32
    %c0_i32_1 = arith.constant 0 : i32
    return %c0_i32, %c0_i32_0 : i32, i32
  }
  func.func @transform_3(%arg0: i32) -> (i32, i32) {
    %c0_i32 = arith.constant 0 : i32
    %c0_i32_0 = arith.constant 0 : i32
    %c0_i32_1 = arith.constant 0 : i32
    return %c0_i32, %c0_i32_0 : i32, i32
  }
  func.func @transform_4(%arg0: i32) -> (i32, i32) {
    %c0_i32 = arith.constant 0 : i32
    %c0_i32_0 = arith.constant 0 : i32
    %c0_i32_1 = arith.constant 0 : i32
    return %c0_i32, %c0_i32_0 : i32, i32
  }
  func.func @transform_5(%arg0: i32) -> (i32, i32) {
    %c0_i32 = arith.constant 0 : i32
    %c0_i32_0 = arith.constant 0 : i32
    return %arg0, %c0_i32 : i32, i32
  }
}

module attributes {stable_mosaic.version = 11 : i64} {
  func.func @_autoencoder_kernel(%arg0: i32, %arg1: memref<8x256xf32, #tpu.memory_space<vmem>>, %arg2: memref<256x128xf32, #tpu.memory_space<vmem>>, %arg3: memref<1x128xf32, #tpu.memory_space<vmem>>, %arg4: memref<128x256xf32, #tpu.memory_space<vmem>>, %arg5: memref<1x256xf32, #tpu.memory_space<vmem>>, %arg6: memref<8x256xf32, #tpu.memory_space<vmem>>) attributes {dimension_semantics = [#tpu.dimension_semantics<parallel>], iteration_bounds = array<i64: 2>, scalar_prefetch = 0 : i64, scratch_operands = 0 : i64, tpu.core_type = #tpu.core_type<tc>, window_params = [{transform_indices = @transform_0, window_bounds = array<i64: 8, 256>}, {pipeline_mode = #tpu.pipeline_mode<synchronous>, transform_indices = @transform_1, window_bounds = array<i64: 256, 128>}, {pipeline_mode = #tpu.pipeline_mode<synchronous>, transform_indices = @transform_2, window_bounds = array<i64: 1, 128>}, {pipeline_mode = #tpu.pipeline_mode<synchronous>, transform_indices = @transform_3, window_bounds = array<i64: 128, 256>}, {pipeline_mode = #tpu.pipeline_mode<synchronous>, transform_indices = @transform_4, window_bounds = array<i64: 1, 256>}, {transform_indices = @transform_5, window_bounds = array<i64: 8, 256>}]} {
    %c0 = arith.constant 0 : index
    %c0_0 = arith.constant 0 : index
    %0 = vector.load %arg1[%c0, %c0_0] : memref<8x256xf32, #tpu.memory_space<vmem>>, vector<8x256xf32>
    %c0_1 = arith.constant 0 : index
    %c0_2 = arith.constant 0 : index
    %1 = vector.load %arg2[%c0_1, %c0_2] : memref<256x128xf32, #tpu.memory_space<vmem>>, vector<256x128xf32>
    %cst = arith.constant dense<0.000000e+00> : vector<8x128xf32>
    %2 = tpu.matmul %0, %1, %cst {dimension_numbers = #tpu.dot_dimension_numbers<[1], [0], [0], [1], [0, 0, 1, 1], [], []>} : vector<8x256xf32>, vector<256x128xf32>, vector<8x128xf32> -> vector<8x128xf32>
    %c0_3 = arith.constant 0 : index
    %c0_4 = arith.constant 0 : index
    %3 = vector.load %arg3[%c0_3, %c0_4] : memref<1x128xf32, #tpu.memory_space<vmem>>, vector<1x128xf32>
    %4 = vector.broadcast %3 : vector<1x128xf32> to vector<8x128xf32>
    %5 = arith.addf %2, %4 : vector<8x128xf32>
    %6 = arith.negf %5 : vector<8x128xf32>
    %7 = math.exp %6 : vector<8x128xf32>
    %cst_5 = arith.constant 1.000000e+00 : f32
    %8 = vector.broadcast %cst_5 : f32 to vector<8x128xf32>
    %9 = arith.addf %8, %7 : vector<8x128xf32>
    %10 = arith.divf %8, %9 : vector<8x128xf32>
    %c0_6 = arith.constant 0 : index
    %c0_7 = arith.constant 0 : index
    %11 = vector.load %arg4[%c0_6, %c0_7] : memref<128x256xf32, #tpu.memory_space<vmem>>, vector<128x256xf32>
    %cst_8 = arith.constant dense<0.000000e+00> : vector<8x256xf32>
    %12 = tpu.matmul %10, %11, %cst_8 {dimension_numbers = #tpu.dot_dimension_numbers<[1], [0], [0], [1], [0, 0, 1, 1], [], []>} : vector<8x128xf32>, vector<128x256xf32>, vector<8x256xf32> -> vector<8x256xf32>
    %c0_9 = arith.constant 0 : index
    %c0_10 = arith.constant 0 : index
    %13 = vector.load %arg5[%c0_9, %c0_10] : memref<1x256xf32, #tpu.memory_space<vmem>>, vector<1x256xf32>
    %14 = vector.broadcast %13 : vector<1x256xf32> to vector<8x256xf32>
    %15 = arith.addf %12, %14 : vector<8x256xf32>
    %16 = arith.negf %15 : vector<8x256xf32>
    %17 = math.exp %16 : vector<8x256xf32>
    %cst_11 = arith.constant 1.000000e+00 : f32
    %18 = vector.broadcast %cst_11 : f32 to vector<8x256xf32>
    %19 = arith.addf %18, %17 : vector<8x256xf32>
    %20 = arith.divf %18, %19 : vector<8x256xf32>
    %c0_12 = arith.constant 0 : index
    %c0_13 = arith.constant 0 : index
    %21 = vector.load %arg6[%c0_12, %c0_13] : memref<8x256xf32, #tpu.memory_space<vmem>>, vector<8x256xf32>
    tpu.vector_store %arg6[%c0_12, %c0_13], %20 {strides = array<i32>} : memref<8x256xf32, #tpu.memory_space<vmem>>, vector<8x256xf32>,
    return
  }
  func.func @transform_0(%arg0: i32) -> (i32, i32) {
    %c0_i32 = arith.constant 0 : i32
    %c0_i32_0 = arith.constant 0 : i32
    return %arg0, %c0_i32 : i32, i32
  }
  func.func @transform_1(%arg0: i32) -> (i32, i32) {
    %c0_i32 = arith.constant 0 : i32
    %c0_i32_0 = arith.constant 0 : i32
    %c0_i32_1 = arith.constant 0 : i32
    return %c0_i32, %c0_i32_0 : i32, i32
  }
  func.func @transform_2(%arg0: i32) -> (i32, i32) {
    %c0_i32 = arith.constant 0 : i32
    %c0_i32_0 = arith.constant 0 : i32
    %c0_i32_1 = arith.constant 0 : i32
    return %c0_i32, %c0_i32_0 : i32, i32
  }
  func.func @transform_3(%arg0: i32) -> (i32, i32) {
    %c0_i32 = arith.constant 0 : i32
    %c0_i32_0 = arith.constant 0 : i32
    %c0_i32_1 = arith.constant 0 : i32
    return %c0_i32, %c0_i32_0 : i32, i32
  }
  func.func @transform_4(%arg0: i32) -> (i32, i32) {
    %c0_i32 = arith.constant 0 : i32
    %c0_i32_0 = arith.constant 0 : i32
    %c0_i32_1 = arith.constant 0 : i32
    return %c0_i32, %c0_i32_0 : i32, i32
  }
  func.func @transform_5(%arg0: i32) -> (i32, i32) {
    %c0_i32 = arith.constant 0 : i32
    %c0_i32_0 = arith.constant 0 : i32
    return %arg0, %c0_i32 : i32, i32
  }
}

</mosaic_0001>

<bundles_post_ra>
// kernel: tpu_custom_call.1
= control target key start
LH: loop header
LB: loop body
LE: loop exit
PB: predicated region body
PF: predicated region fallthrough
CT: control target
= control target key end

     0   :  { %10 = vsyncpa [#allocation3], 0  ;;  %s1137_s0 = inlined_call_operand.hbm [shape: f32[16,256], index: 0, kind: input, shape index: {}]   ;;  %s1138_s1 = inlined_call_operand.hbm [shape: f32[256,128], index: 1, kind: input, shape index: {}]   ;;  %s1139_s2 = inlined_call_operand.vmem [shape: f32[1,128], index: 2, kind: input, shape index: {}]   ;;  %s1140_s3 = inlined_call_operand.hbm [shape: f32[128,256], index: 3, kind: input, shape index: {}]   ;;  %s1141_s4 = inlined_call_operand.vmem [shape: f32[1,256], index: 4, kind: input, shape index: {}]   ;;  %s1142_s5 = inlined_call_operand.hbm [shape: f32[16,256], index: 5, kind: output, shape index: {}]  }
   0x1   :  { %12 = vsyncpa [#allocation3 + $0x1], 0 }
   0x2   :  { %13 = vsyncpa [#allocation6], 0 }
   0x3   :  { %14 = vsyncpa [#allocation4], 0 }
   0x4   :  { %16 = vsyncpa [#allocation4 + $0x1], 0  ;;  %s952_s18 = smov 0   ;;  %s954_s19 = smov 0  }
   0x5   :  { %s956_s20 = smov 0   ;;  %s958_s21 = smov 0  }
   0x6 LB: > { %s973_s22 = sadd.s32 4294967295, %s911_s21   ;;  %s620_s23 = sadd.s32 4294967294, %s911_s21   ;;  %s911_s21 = sphi %s958_s21, %s1164_s21   ;;  %s907_s20 = sphi %s956_s20, %s1163_s20   ;;  %s903_s19 = sphi %s954_s19, %s1162_s19   ;;  %s899_s18 = sphi %s952_s18, %s1161_s18  }
   0x7   : > { %p42_p0 = scmp.ne.s32.totalorder %s903_s19, %s899_s18  ;;  %p1143_p1 = scmp.eq.s32.totalorder %s973_s22, 0 }
   0x8   : > { %p156_p3 = scmp.eq.s32.totalorder %s620_s23, 1  ;;  %p621_p5 = scmp.ge.s32.totalorder %s911_s21, 1 }
   0x9   : > { %p982_p4 = por %p1143_p1, %p42_p0  ;;  %p163_p7 = scmp.lt.s32.totalorder %s911_s21, 3 }
   0xa   : > { %p987_p6 = por %p156_p3, %p42_p0  ;;  %s913_s27 = smov [#allocation5]  }
   0xb   : > { %s1147_s24 = scalar_select %p982_p4, 1, 0 }
   0xc   : > { %s1148_s25 = scalar_select %p987_p6, 1, 0 }
   0xd   : > { %p992_p8 = pnand %p621_p5, %p163_p7  ;;  %s175_s28 = sshll.u32 %s913_s27, 4  ;;  %s176_s28 = int_to_ptr.vmem [resolvable:$true] %s175_s28 }
   0xe   : > { %s914_s30 = smov [#allocation7]   ;;  %s774_s7 = scalar_lea.vmem %s176_s28, 4096 }
   0xf   : > { %s1149_s26 = scalar_select %p992_p8, 1, 0 }
  0x10   : > { %p691_p9 = pneg %p992_p8  ;;  %s191_s6 = sshll.u32 %s914_s30, 4  ;;  %s192_s6 = int_to_ptr.vmem [resolvable:$true] %s191_s6 }
  0x11   : > { %p775_p13 = scmp.ne.s32.totalorder %s176_s28, %s774_s7  ;;  %p782_p5 = scmp.lt.s32.totalorder %s176_s28, %s176_s28 }
  0x12   : > { %p1001_p11 = pnand %p691_p9, %p1143_p1  ;;  %p783_p7 = scmp.lt.s32.totalorder %s774_s7, %s774_s7 }
  0x14   : > { %p765_p12 = pneg %p1001_p11  ;;  %p784_p10 = por %p783_p7, %p782_p5 }
  0x16   : > { %p777_p0 = pnand %p775_p13, %p765_p12 }
  0x18   : > { %p778_p3 = pneg %p777_p0 }
  0x1a   : > { %p785_p9 = pnand %p784_p10, %p778_p3 }
  0x1c   : > { %788 = shalt.err (!%p785_p9)
}
  0x1d   : > { %s915_s8 = smov 128   ;;  %s916_s9 = smov 8  }
  0x1e   : > { %694 = dma.hbm_to_vmem [thread:$0]  (!%p1001_p11), %s1138_s1, 4096, %s176_s28, [#allocation6], %s915_s8, %s915_s8, %s916_s9  }
  0x1f   : > { %s800_s12 = scalar_lea.vmem %s192_s6, 4096  ;;  %p808_p2 = scmp.lt.s32.totalorder %s192_s6, %s192_s6 }
  0x20   : > { %p801_p1 = scmp.ne.s32.totalorder %s192_s6, %s800_s12  ;;  %p809_p6 = scmp.lt.s32.totalorder %s800_s12, %s800_s12 }
  0x22   : > { %p803_p13 = pnand %p801_p1, %p765_p12  ;;  %p810_p5 = por %p809_p6, %p808_p2 }
  0x24   : > { %p804_p0 = pneg %p803_p13 }
  0x26   : > { %p811_p10 = pnand %p810_p5, %p804_p0 }
  0x28   : > { %814 = shalt.err (!%p811_p10)
}
  0x29   : > { %s917_s13 = smov 256   ;;  %s918_s14 = smov 16  }
  0x2a   : > { %697 = dma.hbm_to_vmem [thread:$0]  (!%p1001_p11), %s1140_s3, 4096, %s192_s6, [#allocation6], %s917_s13, %s917_s13, %s918_s14  }
  0x2b   : > { %s1024_s17 = sadd.s32 1, %s911_s21   ;;  %s29_s27 = sadd.s32 1, %s907_s20 }
  0x2c   : > { %s26_s23 = ssub.s32 %s911_s21, %s1024_s17  ;;  %p36_p2 = scmp.ne.s32.totalorder %s907_s20, %s903_s19 }
  0x2d   : > { %p27_p1 = scmp.eq.s32.totalorder %s26_s23, 0  ;;  %p37_p6 = scmp.eq.s32.totalorder %s911_s21, 0 }
  0x2e   : > { %p1151_p3 = scmp.eq.s32.totalorder %s973_s22, 1  ;;  %p708_p9 = scmp.lt.s32.totalorder %s911_s21, 2 }
  0x2f   : > { %s1033_s28 = scalar_select %p27_p1, %s907_s20, %s29_s27  }
  0x30   : > { %p38_p12 = por %p37_p6, %p36_p2  ;;  %p1037_p7 = por %p1151_p3, %p36_p2 }
  0x31   : > { %s208_s29 = sand.u32 1, %s907_s20   ;;  %s642_s6 = sshll.u32 %s911_s21, 8 }
  0x32   : > { %s1152_s30 = scalar_select %p1037_p7, 1, 0 }
  0x33   : > { %s625_s7 = sshll.u32 %s208_s29, 4  ;;  %s1047_s10 = scalar_lea.hbm %s1137_s0, %s642_s6 }
  0x34   : > { %s212_s11 = scalar_lea.vmem [#allocation2], %s625_s7  ;;  %p1049_p11 = pnand %p708_p9, %p38_p12 }
  0x35   : > { %s220_s12 = sshll.u32 %s212_s11, 4  ;;  %s209_s14 = scalar_lea.sflag [#allocation3], %s208_s29  ;;  %s221_s12 = int_to_ptr.vmem [resolvable:$true] %s220_s12 }
  0x36   : > { %s815_s15 = scalar_lea.hbm %s1047_s10, 256  ;;  %p817_p0 = pneg %p1049_p11 }
  0x37   : > { %p816_p13 = scmp.ne.s32.totalorder %s1047_s10, %s815_s15  ;;  %s820_s27 = scalar_lea.hbm %s1137_s0, 512 }
  0x38   : > { %p821_p1 = scmp.lt.s32.totalorder %s1047_s10, %s1137_s0  ;;  %p822_p2 = scmp.lt.s32.totalorder %s820_s27, %s815_s15 }
  0x39   : > { %p818_p5 = pnand %p817_p0, %p816_p13 }
  0x3a   : > { %p823_p6 = por %p822_p2, %p821_p1 }
  0x3b   : > { %p819_p10 = pneg %p818_p5 }
  0x3d   : > { %p824_p12 = pnand %p823_p6, %p819_p10 }
  0x3f   : > { %827 = shalt.err (!%p824_p12)
}
  0x40   : > { %s828_s8 = scalar_lea.vmem %s221_s12, 256  ;;  %s919_s29 = smov [#allocation2]  }
  0x41   : > { %p829_p3 = scmp.ne.s32.totalorder %s221_s12, %s828_s8  ;;  %s833_s9 = sshll.u32 %s919_s29, 4  ;;  %s834_s9 = int_to_ptr.vmem [resolvable:$false] %s833_s9 }
  0x42   : > { %s835_s11 = scalar_lea.vmem %s834_s9, 512  ;;  %p836_p13 = scmp.lt.s32.totalorder %s221_s12, %s834_s9 }
  0x43   : > { %p831_p9 = pnand %p829_p3, %p817_p0  ;;  %p837_p5 = scmp.lt.s32.totalorder %s835_s11, %s828_s8 }
  0x45   : > { %p832_p7 = pneg %p831_p9  ;;  %p838_p4 = por %p837_p5, %p836_p13 }
  0x47   : > { %p839_p8 = pnand %p838_p4, %p832_p7 }
  0x49   : > { %842 = shalt.err (!%p839_p8)
}
  0x4a   : > { %701 = dma.hbm_to_vmem [thread:$0]  (!%p1049_p11), %s1047_s10, 256, %s221_s12, %s209_s14  }
  0x4b   : > { %p1154_p10 = scmp.ne.s32.totalorder %s1149_s26, 0 }
  0x4c   : > { %s1070_s15 = sand.u32 (!%p1154_p10), 1, %s903_s19   ;;  %p1155_p4 = scmp.ne.s32.totalorder (!%p1154_p10), %s1147_s24, 0 }
  0x4d   : > { %229 = sbr.rel (%p1154_p10) target bundleno = 592 (0x250), region = 40  ;;  %s629_s16 = sshll.u32 (!%p1154_p10), %s1070_s15, 4 }
  0x4e   : > { %s232_s23 = scalar_lea.sflag (!%p1154_p10), [#allocation3], %s1070_s15  ;;  %s1076_s27 = scalar_lea.vmem (!%p1154_p10), [#allocation2], %s629_s16 }
  0x52   : > { %886 = dma.done.wait (%p1155_p4), %s232_s23, 256  }
  0x53   : > { %888 = vsyncadd (%p1155_p4), %s232_s23, 4294967040  ;;  %p1156_p8 = scmp.eq.s32.totalorder %s973_s22, 0 }
  0x55   : > { %890 = dma.done.wait (%p1156_p8), [#allocation6], 8192   ;;  %p1157_p7 = pmov %p1156_p8 }
  0x56   : > { %v303_v0 = vld [vmem:[#allocation5 + $0xf8] sm:$0xff]  ;;  %v302_v2 = vld [vmem:[#allocation5 + $0xf0] sm:$0xff]  ;;  %v301_v4 = vld [vmem:[#allocation5 + $0xe8] sm:$0xff]  ;;  %v920_v57 = vmov 0.0   ;;  %s643_s13 = sshll.u32 %s973_s22, 8  ;;  %s269_s14 = scalar_lea.vmem [#allocation8], %s629_s16 }
  0x57   : > { %892 = vsyncadd (%p1157_p7), [#allocation6], 4294959104  ;;  %v287_v1 = vld [vmem:[#allocation5 + $0x78] sm:$0xff]  ;;  %644 = vmatprep.subr.mxu0 %v303_v0  ;;  %v286_v3 = vld [vmem:[#allocation5 + $0x70] sm:$0xff]  ;;  %495 = vmatprep.mubr.f32.mxu1 %v920_v57  ;;  %s531_s6 = sshll.u32 %s269_s14, 4  ;;  %s1100_s29 = scalar_lea.hbm %s1142_s5, %s643_s13  ;;  %s532_s6 = int_to_ptr.vmem [resolvable:$true] %s531_s6 }
  0x58   : > { %645 = vmatpush3.msra.mxu0 %v287_v1  ;;  %v285_v5 = vld [vmem:[#allocation5 + $0x68] sm:$0xff]  ;;  %v300_v6 = vld [vmem:[#allocation5 + $0xe0] sm:$0xff]  ;;  %v299_v8 = vld [vmem:[#allocation5 + $0xd8] sm:$0xff]  ;;  %s517_s9 = scalar_lea.sflag [#allocation4], %s1070_s15  ;;  %s843_s11 = scalar_lea.vmem %s532_s6, 256 }
  0x59   : > { %646 = vmatprep.subr.mxu0 %v302_v2  ;;  %v284_v7 = vld [vmem:[#allocation5 + $0x60] sm:$0xff]  ;;  %v283_v9 = vld [vmem:[#allocation5 + $0x58] sm:$0xff]  ;;  %v298_v10 = vld [vmem:[#allocation5 + $0xd0] sm:$0xff]  ;;  %p844_p11 = scmp.ne.s32.totalorder %s532_s6, %s843_s11  ;;  %p1158_p0 = scmp.ne.s32.totalorder %s1152_s30, 0 }
  0x5a   : > { %647 = vmatpush3.msra.mxu0 %v286_v3  ;;  %v282_v11 = vld [vmem:[#allocation5 + $0x50] sm:$0xff]  ;;  %v297_v12 = vld [vmem:[#allocation5 + $0xc8] sm:$0xff]  ;;  %v296_v15 = vld [vmem:[#allocation5 + $0xc0] sm:$0xff]  ;;  %s921_s22 = smov [#allocation8]  }
  0x5b   : > { %648 = vmatprep.subr.mxu0 %v301_v4  ;;  %v271_v13 = vld [vmem:[%s1076_s27 + $0x8] sm:$0xff]  ;;  %v280_v16 = vld [vmem:[#allocation5 + $0x40] sm:$0xff]  ;;  %v294_v19 = vld [vmem:[#allocation5 + $0xb0] sm:$0xff]  ;;  %p845_p1 = pnand %p844_p11, %p1158_p0  ;;  %s847_s23 = sshll.u32 %s921_s22, 4  ;;  %s848_s23 = int_to_ptr.vmem [resolvable:$false] %s847_s23 }
  0x5c   : > { %649 = vmatpush3.msra.mxu0 %v285_v5  ;;  %v281_v14 = vld [vmem:[#allocation5 + $0x48] sm:$0xff]  ;;  %375 = vmatprep.mubr.f32.mxu0 %v271_v13  ;;  %v295_v17 = vld [vmem:[#allocation5 + $0xb8] sm:$0xff]  ;;  %v278_v20 = vld [vmem:[#allocation5 + $0x30] sm:$0xff]  ;;  %s849_s16 = scalar_lea.vmem %s848_s23, 512  ;;  %p850_p6 = scmp.lt.s32.totalorder %s532_s6, %s848_s23 }
  0x5d   : > { %650 = vmatprep.subr.mxu0 %v300_v6  ;;  %v279_v18 = vld [vmem:[#allocation5 + $0x38] sm:$0xff]  ;;  %v293_v21 = vld [vmem:[#allocation5 + $0xa8] sm:$0xff]  ;;  %v292_v23 = vld [vmem:[#allocation5 + $0xa0] sm:$0xff]  ;;  %p846_p2 = pneg %p845_p1  ;;  %p851_p12 = scmp.lt.s32.totalorder %s849_s16, %s843_s11 }
  0x5e   : > { %651 = vmatpush3.msra.mxu0 %v284_v7  ;;  %v277_v22 = vld [vmem:[#allocation5 + $0x28] sm:$0xff]  ;;  %v276_v24 = vld [vmem:[#allocation5 + $0x20] sm:$0xff]  ;;  %v291_v25 = vld [vmem:[#allocation5 + $0x98] sm:$0xff] }
  0x5f   : > { %652 = vmatprep.subr.mxu0 %v299_v8  ;;  %v275_v26 = vld [vmem:[#allocation5 + $0x18] sm:$0xff]  ;;  %v290_v27 = vld [vmem:[#allocation5 + $0x90] sm:$0xff]  ;;  %v289_v29 = vld [vmem:[#allocation5 + $0x88] sm:$0xff]  ;;  %p852_p3 = por %p851_p12, %p850_p6 }
  0x60   : > { %653 = vmatpush3.msra.mxu0 %v283_v9  ;;  %v274_v28 = vld [vmem:[#allocation5 + $0x10] sm:$0xff]  ;;  %v273_v30 = vld [vmem:[#allocation5 + $0x8] sm:$0xff]  ;;  %v288_v31 = vld [vmem:[#allocation5 + $0x80] sm:$0xff] }
  0x61   : > { %654 = vmatprep.subr.mxu0 %v298_v10  ;;  %v272_v32 = vld [vmem:[#allocation5] sm:$0xff]  ;;  %v418_v34 = vld [vmem:[#allocation7 + $0xf8] sm:$0xff]  ;;  %v417_v35 = vld [vmem:[#allocation7 + $0xf0] sm:$0xff]  ;;  %p853_p9 = pnand %p852_p3, %p846_p2 }
  0x62   : > { %655 = vmatpush3.msra.mxu0 %v282_v11  ;;  %v270_v33 = vld [vmem:[%s1076_s27] sm:$0xff]  ;;  %431 = vmatprep.subr.mxu1 %v418_v34  ;;  %v416_v36 = vld [vmem:[#allocation7 + $0xe8] sm:$0xff]  ;;  %v414_v38 = vld [vmem:[#allocation7 + $0xd8] sm:$0xff] }
  0x63   : > { %656 = vmatprep.subr.mxu0 %v297_v12  ;;  %432 = vmatpush1.msra.mxu1 %v417_v35  ;;  %v415_v37 = vld [vmem:[#allocation7 + $0xe0] sm:$0xff]  ;;  %v413_v39 = vld [vmem:[#allocation7 + $0xd0] sm:$0xff]  ;;  %v412_v40 = vld [vmem:[#allocation7 + $0xc8] sm:$0xff]  ;;  %v421_v12 = vlaneseq }
  0x64   : > { %657 = vmatpush3.msra.mxu0 %v281_v14  ;;  %433 = vmatprep.subr.mxu1 %v416_v36  ;;  %v411_v41 = vld [vmem:[#allocation7 + $0xc0] sm:$0xff]  ;;  %v410_v42 = vld [vmem:[#allocation7 + $0xb8] sm:$0xff]  ;;  %v409_v43 = vld [vmem:[#allocation7 + $0xb0] sm:$0xff] }
  0x65   : > { %658 = vmatprep.subr.mxu0 %v296_v15  ;;  %434 = vmatpush1.msra.mxu1 %v415_v37  ;;  %v408_v44 = vld [vmem:[#allocation7 + $0xa8] sm:$0xff]  ;;  %v407_v45 = vld [vmem:[#allocation7 + $0xa0] sm:$0xff]  ;;  %v406_v46 = vld [vmem:[#allocation7 + $0x98] sm:$0xff]  ;;  %v422_v13 = vshrl.u32 %v421_v12, 7 }
  0x66   : > { %659 = vmatpush3.msra.mxu0 %v280_v16  ;;  %435 = vmatprep.subr.mxu1 %v414_v38  ;;  %v405_v47 = vld [vmem:[#allocation7 + $0x90] sm:$0xff]  ;;  %v404_v48 = vld [vmem:[#allocation7 + $0x88] sm:$0xff]  ;;  %v403_v49 = vld [vmem:[#allocation7 + $0x80] sm:$0xff] }
  0x67   : > { %660 = vmatprep.subr.mxu0 %v295_v17  ;;  %436 = vmatpush1.msra.mxu1 %v413_v39  ;;  %v402_v50 = vld [vmem:[#allocation7 + $0x78] sm:$0xff]  ;;  %v401_v51 = vld [vmem:[#allocation7 + $0x70] sm:$0xff]  ;;  %v400_v52 = vld [vmem:[#allocation7 + $0x68] sm:$0xff]  ;;  %v423_v14 = vsub.s32 0, %v422_v13  ;;  %v427_v16 = vsub.s32 1, %v422_v13 }
  0x68   : > { %661 = vmatpush3.msra.mxu0 %v279_v18  ;;  %437 = vmatprep.subr.mxu1 %v412_v40  ;;  %v399_v53 = vld [vmem:[#allocation7 + $0x60] sm:$0xff]  ;;  %v398_v54 = vld [vmem:[#allocation7 + $0x58] sm:$0xff]  ;;  %v397_v55 = vld [vmem:[#allocation7 + $0x50] sm:$0xff] }
  0x69   : > { %662 = vmatprep.subr.mxu0 %v294_v19  ;;  %438 = vmatpush1.msra.mxu1 %v411_v41  ;;  %v396_v56 = vld [vmem:[#allocation7 + $0x48] sm:$0xff]  ;;  %v395_v58 = vld [vmem:[#allocation7 + $0x40] sm:$0xff]  ;;  %v394_v59 = vld [vmem:[#allocation7 + $0x38] sm:$0xff] }
  0x6a   : > { %663 = vmatpush3.msra.mxu0 %v278_v20  ;;  %439 = vmatprep.subr.mxu1 %v410_v42  ;;  %v393_v60 = vld [vmem:[#allocation7 + $0x30] sm:$0xff]  ;;  %v392_v61 = vld [vmem:[#allocation7 + $0x28] sm:$0xff]  ;;  %v391_v62 = vld [vmem:[#allocation7 + $0x20] sm:$0xff] }
  0x6b   : > { %664 = vmatprep.subr.mxu0 %v293_v21  ;;  %440 = vmatpush1.msra.mxu1 %v409_v43  ;;  %v390_v63 = vld [vmem:[#allocation7 + $0x18] sm:$0xff]  ;;  %v389_v0 = vld [vmem:[#allocation7 + $0x10] sm:$0xff]  ;;  %v388_v1 = vld [vmem:[#allocation7 + $0x8] sm:$0xff] }
  0x6c   : > { %665 = vmatpush3.msra.mxu0 %v277_v22  ;;  %441 = vmatprep.subr.mxu1 %v408_v44  ;;  %v387_v2 = vld [vmem:[#allocation7] sm:$0xff] }
  0x6d   : > { %666 = vmatprep.subr.mxu0 %v292_v23  ;;  %442 = vmatpush1.msra.mxu1 %v407_v45  ;;  %v633_v4 = vld [vmem:[%s1139_s2] ss:$0 sm:$0xff] }
  0x6e   : > { %667 = vmatpush3.msra.mxu0 %v276_v24  ;;  %443 = vmatprep.subr.mxu1 %v406_v46  ;;  %v419_v15 = vld [vmem:[%s1141_s4] sm:$0x3] }
  0x6f   : > { %668 = vmatprep.subr.mxu0 %v291_v25  ;;  %444 = vmatpush1.msra.mxu1 %v405_v47  ;;  %v424_v17 = vrot.slane %v419_v15, %v423_v14  ;;  %v428_v18 = vrot.slane %v419_v15, %v427_v16 }
  0x70   : > { %669 = vmatpush3.msra.mxu0 %v275_v26  ;;  %445 = vmatprep.subr.mxu1 %v404_v48 }
  0x71   : > { %670 = vmatprep.subr.mxu0 %v290_v27  ;;  %446 = vmatpush1.msra.mxu1 %v403_v49 }
  0x72   : > { %671 = vmatpush3.msra.mxu0 %v274_v28  ;;  %447 = vmatprep.subr.mxu1 %v402_v50 }
  0x73   : > { %672 = vmatprep.subr.mxu0 %v289_v29  ;;  %448 = vmatpush1.msra.mxu1 %v401_v51 }
  0x74   : > { %673 = vmatpush3.msra.mxu0 %v273_v30  ;;  %449 = vmatprep.subr.mxu1 %v400_v52 }
  0x75   : > { %674 = vmatprep.subr.mxu0 %v288_v31  ;;  %450 = vmatpush1.msra.mxu1 %v399_v53 }
  0x76   : > { %675 = vmatpush3.msra.mxu0 %v272_v32  ;;  %451 = vmatprep.subr.mxu1 %v398_v54 }
  0x77   : > { %376 = vmatmul.mubr.f32.vlgmr.msra.gmra.mxu0 %v270_v33  ;;  %452 = vmatpush1.msra.mxu1 %v397_v55 }
  0x78   : > { %453 = vmatprep.subr.mxu1 %v396_v56 }
  0x79   : > { %454 = vmatpush1.msra.mxu1 %v395_v58 }
  0x7a   : > { %455 = vmatprep.subr.mxu1 %v394_v59 }
  0x7b   : > { %456 = vmatpush1.msra.mxu1 %v393_v60 }
  0x7c   : > { %457 = vmatprep.subr.mxu1 %v392_v61 }
  0x7d   : > { %458 = vmatpush1.msra.mxu1 %v391_v62 }
  0x7e   : > { %459 = vmatprep.subr.mxu1 %v390_v63 }
  0x7f   : > { %460 = vmatpush1.msra.mxu1 %v389_v0 }
  0x80   : > { %461 = vmatprep.subr.mxu1 %v388_v1 }
  0x81   : > { %462 = vmatpush1.msra.mxu1 %v387_v2 }
 0x137   : > { %v676_v3 = vpop.f32.mrf.mxu0 }
 0x139   : > { %v677_v5 = vpop.f32.mrf.mxu0 }
 0x13a   : > { %v678_v6 = vadd.f32 %v677_v5, %v676_v3 }
 0x13c   : > { %v378_v7 = vadd.f32 %v678_v6, %v633_v4 }
 0x13e   : > { %v634_v8 = vmul.f32 -1.442695, %v378_v7 }
 0x140   : > { %751 = vpow2.f32 %v634_v8 }
 0x14d   : > { %v752_v9 = vpop.eup %751 }
 0x14e   : > { %v384_v10 = vadd.f32 1.0, %v752_v9 }
 0x150   : > { %753 = vrcp.f32 %v384_v10 }
 0x15d   : > { %v754_v11 = vpop.eup %753 }
 0x15e   : > { %496 = vmatmul.mubr.f32.vlgmr.msra.gmra.mxu1 %v754_v11 }
 0x21e   : > { %v497_v19 = vpop.f32.mrf.mxu1 }
 0x21f   : > { %v498_v20 = vadd.f32 %v497_v19, %v424_v17 }
 0x220   : > { %v499_v21 = vpop.f32.mrf.mxu1 }
 0x221   : > { %v635_v22 = vmul.f32 -1.442695, %v498_v20  ;;  %v500_v23 = vadd.f32 %v499_v21, %v428_v18 }
 0x223   : > { %755 = vpow2.f32 %v635_v22  ;;  %v636_v24 = vmul.f32 -1.442695, %v500_v23 }
 0x225   : > { %757 = vpow2.f32 %v636_v24 }
 0x230   : > { %v756_v25 = vpop.eup %755 }
 0x231   : > { %v508_v26 = vadd.f32 1.0, %v756_v25 }
 0x232   : > { %v758_v27 = vpop.eup %757 }
 0x233   : > { %759 = vrcp.f32 %v508_v26  ;;  %v509_v28 = vadd.f32 1.0, %v758_v27 }
 0x235   : > { %761 = vrcp.f32 %v509_v28 }
 0x240   : > { %v760_v29 = vpop.eup %759 }
 0x241   : > { %514 = vst [vmem:[%s269_s14] sm:$0xff] %v760_v29 }
 0x242   : > { %v762_v30 = vpop.eup %761 }
 0x243   : > { %515 = vst [vmem:[%s269_s14 + $0x8] sm:$0xff] %v762_v30 }
 0x244   : > { %856 = shalt.err (!%p853_p9)
}
 0x245   : > { %s857_s27 = scalar_lea.hbm %s1100_s29, 256  ;;  %s861_s26 = scalar_lea.hbm %s1142_s5, 512 }
 0x246   : > { %p858_p13 = scmp.ne.s32.totalorder %s1100_s29, %s857_s27  ;;  %p862_p4 = scmp.lt.s32.totalorder %s1100_s29, %s1142_s5 }
 0x247   : > { %p863_p8 = scmp.lt.s32.totalorder %s861_s26, %s857_s27 }
 0x248   : > { %p859_p5 = pnand %p858_p13, %p1158_p0 }
 0x249   : > { %p864_p7 = por %p863_p8, %p862_p4 }
 0x24a   : > { %p860_p10 = pneg %p859_p5 }
 0x24c   : > { %p865_p11 = pnand %p864_p7, %p860_p10 }
 0x24e   : > { %868 = shalt.err (!%p865_p11)
}
 0x24f   : > { %689 = dma.vmem_to_hbm [thread:$0]  (%p1158_p0), %s532_s6, 256, %s1100_s29, %s517_s9  }
 0x250 PF: > { %s543_s13 = sand.u32 1, %s899_s18   ;;  %p1159_p1 = scmp.ne.s32.totalorder %s1148_s25, 0 }
 0x251   : > { %p1160_p2 = scmp.ge.s32.totalorder %s911_s21, 2  ;;  %s544_s14 = scalar_lea.sflag [#allocation4], %s543_s13 }
 0x253   : > { %p703_p6 = pnand %p1160_p2, %p1159_p1 }
 0x255   : > { %p704_p12 = pneg %p703_p6 }
 0x257   : > { %894 = dma.done.wait (%p704_p12), %s544_s14, 256  }
 0x258   : > { %896 = vsyncadd (%p704_p12), %s544_s14, 4294967040  ;;  %p19_p3 = scmp.ge.s32.totalorder %s1024_s17, 4   ;;  %s1161_s18 = smov %s903_s19 }
 0x259   : > { %s1162_s19 = smov %s907_s20  ;;  %s1163_s20 = smov %s1033_s28 }
 0x25a   : > { %s1164_s21 = smov %s1024_s17  ;;  %21 = sbr.rel (!%p19_p3) target bundleno = 6 (0x6), region = 93 }
 0x25f   :  { %549 = vsyncpa [#allocation3], 1 }
 0x260   :  { %551 = vsyncpa [#allocation3 + $0x1], 1 }
 0x261   :  { %552 = vsyncpa [#allocation6], 1 }
 0x262   :  { %553 = vsyncpa [#allocation4], 1 }
 0x263   :  { %555 = vsyncpa [#allocation4 + $0x1], 1 }

// kernel: tpu_custom_call.1
= control target key start
LH: loop header
LB: loop body
LE: loop exit
PB: predicated region body
PF: predicated region fallthrough
CT: control target
= control target key end

     0   :  { %10 = vsyncpa [#allocation3], 0  ;;  %s1137_s0 = inlined_call_operand.hbm [shape: f32[16,256], index: 0, kind: input, shape index: {}]   ;;  %s1138_s1 = inlined_call_operand.hbm [shape: f32[256,128], index: 1, kind: input, shape index: {}]   ;;  %s1139_s2 = inlined_call_operand.vmem [shape: f32[1,128], index: 2, kind: input, shape index: {}]   ;;  %s1140_s3 = inlined_call_operand.hbm [shape: f32[128,256], index: 3, kind: input, shape index: {}]   ;;  %s1141_s4 = inlined_call_operand.vmem [shape: f32[1,256], index: 4, kind: input, shape index: {}]   ;;  %s1142_s5 = inlined_call_operand.hbm [shape: f32[16,256], index: 5, kind: output, shape index: {}]  }
   0x1   :  { %12 = vsyncpa [#allocation3 + $0x1], 0 }
   0x2   :  { %13 = vsyncpa [#allocation6], 0 }
   0x3   :  { %14 = vsyncpa [#allocation4], 0 }
   0x4   :  { %16 = vsyncpa [#allocation4 + $0x1], 0  ;;  %s952_s18 = smov 0   ;;  %s954_s19 = smov 0  }
   0x5   :  { %s956_s20 = smov 0   ;;  %s958_s21 = smov 0  }
   0x6 LB: > { %s973_s22 = sadd.s32 4294967295, %s911_s21   ;;  %s620_s23 = sadd.s32 4294967294, %s911_s21   ;;  %s911_s21 = sphi %s958_s21, %s1164_s21   ;;  %s907_s20 = sphi %s956_s20, %s1163_s20   ;;  %s903_s19 = sphi %s954_s19, %s1162_s19   ;;  %s899_s18 = sphi %s952_s18, %s1161_s18  }
   0x7   : > { %p42_p0 = scmp.ne.s32.totalorder %s903_s19, %s899_s18  ;;  %p1143_p1 = scmp.eq.s32.totalorder %s973_s22, 0 }
   0x8   : > { %p156_p3 = scmp.eq.s32.totalorder %s620_s23, 1  ;;  %p621_p5 = scmp.ge.s32.totalorder %s911_s21, 1 }
   0x9   : > { %p982_p4 = por %p1143_p1, %p42_p0  ;;  %p163_p7 = scmp.lt.s32.totalorder %s911_s21, 3 }
   0xa   : > { %p987_p6 = por %p156_p3, %p42_p0  ;;  %s913_s27 = smov [#allocation5]  }
   0xb   : > { %s1147_s24 = scalar_select %p982_p4, 1, 0 }
   0xc   : > { %s1148_s25 = scalar_select %p987_p6, 1, 0 }
   0xd   : > { %p992_p8 = pnand %p621_p5, %p163_p7  ;;  %s175_s28 = sshll.u32 %s913_s27, 4  ;;  %s176_s28 = int_to_ptr.vmem [resolvable:$true] %s175_s28 }
   0xe   : > { %s914_s30 = smov [#allocation7]   ;;  %s774_s7 = scalar_lea.vmem %s176_s28, 4096 }
   0xf   : > { %s1149_s26 = scalar_select %p992_p8, 1, 0 }
  0x10   : > { %p691_p9 = pneg %p992_p8  ;;  %s191_s6 = sshll.u32 %s914_s30, 4  ;;  %s192_s6 = int_to_ptr.vmem [resolvable:$true] %s191_s6 }
  0x11   : > { %p775_p13 = scmp.ne.s32.totalorder %s176_s28, %s774_s7  ;;  %p782_p5 = scmp.lt.s32.totalorder %s176_s28, %s176_s28 }
  0x12   : > { %p1001_p11 = pnand %p691_p9, %p1143_p1  ;;  %p783_p7 = scmp.lt.s32.totalorder %s774_s7, %s774_s7 }
  0x14   : > { %p765_p12 = pneg %p1001_p11  ;;  %p784_p10 = por %p783_p7, %p782_p5 }
  0x16   : > { %p777_p0 = pnand %p775_p13, %p765_p12 }
  0x18   : > { %p778_p3 = pneg %p777_p0 }
  0x1a   : > { %p785_p9 = pnand %p784_p10, %p778_p3 }
  0x1c   : > { %788 = shalt.err (!%p785_p9)
}
  0x1d   : > { %s915_s8 = smov 128   ;;  %s916_s9 = smov 8  }
  0x1e   : > { %694 = dma.hbm_to_vmem [thread:$0]  (!%p1001_p11), %s1138_s1, 4096, %s176_s28, [#allocation6], %s915_s8, %s915_s8, %s916_s9  }
  0x1f   : > { %s800_s12 = scalar_lea.vmem %s192_s6, 4096  ;;  %p808_p2 = scmp.lt.s32.totalorder %s192_s6, %s192_s6 }
  0x20   : > { %p801_p1 = scmp.ne.s32.totalorder %s192_s6, %s800_s12  ;;  %p809_p6 = scmp.lt.s32.totalorder %s800_s12, %s800_s12 }
  0x22   : > { %p803_p13 = pnand %p801_p1, %p765_p12  ;;  %p810_p5 = por %p809_p6, %p808_p2 }
  0x24   : > { %p804_p0 = pneg %p803_p13 }
  0x26   : > { %p811_p10 = pnand %p810_p5, %p804_p0 }
  0x28   : > { %814 = shalt.err (!%p811_p10)
}
  0x29   : > { %s917_s13 = smov 256   ;;  %s918_s14 = smov 16  }
  0x2a   : > { %697 = dma.hbm_to_vmem [thread:$0]  (!%p1001_p11), %s1140_s3, 4096, %s192_s6, [#allocation6], %s917_s13, %s917_s13, %s918_s14  }
  0x2b   : > { %s1024_s17 = sadd.s32 1, %s911_s21   ;;  %s29_s27 = sadd.s32 1, %s907_s20 }
  0x2c   : > { %s26_s23 = ssub.s32 %s911_s21, %s1024_s17  ;;  %p36_p2 = scmp.ne.s32.totalorder %s907_s20, %s903_s19 }
  0x2d   : > { %p27_p1 = scmp.eq.s32.totalorder %s26_s23, 0  ;;  %p37_p6 = scmp.eq.s32.totalorder %s911_s21, 0 }
  0x2e   : > { %p1151_p3 = scmp.eq.s32.totalorder %s973_s22, 1  ;;  %p708_p9 = scmp.lt.s32.totalorder %s911_s21, 2 }
  0x2f   : > { %s1033_s28 = scalar_select %p27_p1, %s907_s20, %s29_s27  }
  0x30   : > { %p38_p12 = por %p37_p6, %p36_p2  ;;  %p1037_p7 = por %p1151_p3, %p36_p2 }
  0x31   : > { %s208_s29 = sand.u32 1, %s907_s20   ;;  %s642_s6 = sshll.u32 %s911_s21, 8 }
  0x32   : > { %s1152_s30 = scalar_select %p1037_p7, 1, 0 }
  0x33   : > { %s625_s7 = sshll.u32 %s208_s29, 4  ;;  %s1047_s10 = scalar_lea.hbm %s1137_s0, %s642_s6 }
  0x34   : > { %s212_s11 = scalar_lea.vmem [#allocation2], %s625_s7  ;;  %p1049_p11 = pnand %p708_p9, %p38_p12 }
  0x35   : > { %s220_s12 = sshll.u32 %s212_s11, 4  ;;  %s209_s14 = scalar_lea.sflag [#allocation3], %s208_s29  ;;  %s221_s12 = int_to_ptr.vmem [resolvable:$true] %s220_s12 }
  0x36   : > { %s815_s15 = scalar_lea.hbm %s1047_s10, 256  ;;  %p817_p0 = pneg %p1049_p11 }
  0x37   : > { %p816_p13 = scmp.ne.s32.totalorder %s1047_s10, %s815_s15  ;;  %s820_s27 = scalar_lea.hbm %s1137_s0, 512 }
  0x38   : > { %p821_p1 = scmp.lt.s32.totalorder %s1047_s10, %s1137_s0  ;;  %p822_p2 = scmp.lt.s32.totalorder %s820_s27, %s815_s15 }
  0x39   : > { %p818_p5 = pnand %p817_p0, %p816_p13 }
  0x3a   : > { %p823_p6 = por %p822_p2, %p821_p1 }
  0x3b   : > { %p819_p10 = pneg %p818_p5 }
  0x3d   : > { %p824_p12 = pnand %p823_p6, %p819_p10 }
  0x3f   : > { %827 = shalt.err (!%p824_p12)
}
  0x40   : > { %s828_s8 = scalar_lea.vmem %s221_s12, 256  ;;  %s919_s29 = smov [#allocation2]  }
  0x41   : > { %p829_p3 = scmp.ne.s32.totalorder %s221_s12, %s828_s8  ;;  %s833_s9 = sshll.u32 %s919_s29, 4  ;;  %s834_s9 = int_to_ptr.vmem [resolvable:$false] %s833_s9 }
  0x42   : > { %s835_s11 = scalar_lea.vmem %s834_s9, 512  ;;  %p836_p13 = scmp.lt.s32.totalorder %s221_s12, %s834_s9 }
  0x43   : > { %p831_p9 = pnand %p829_p3, %p817_p0  ;;  %p837_p5 = scmp.lt.s32.totalorder %s835_s11, %s828_s8 }
  0x45   : > { %p832_p7 = pneg %p831_p9  ;;  %p838_p4 = por %p837_p5, %p836_p13 }
  0x47   : > { %p839_p8 = pnand %p838_p4, %p832_p7 }
  0x49   : > { %842 = shalt.err (!%p839_p8)
}
  0x4a   : > { %701 = dma.hbm_to_vmem [thread:$0]  (!%p1049_p11), %s1047_s10, 256, %s221_s12, %s209_s14  }
  0x4b   : > { %p1154_p10 = scmp.ne.s32.totalorder %s1149_s26, 0 }
  0x4c   : > { %s1070_s15 = sand.u32 (!%p1154_p10), 1, %s903_s19   ;;  %p1155_p4 = scmp.ne.s32.totalorder (!%p1154_p10), %s1147_s24, 0 }
  0x4d   : > { %229 = sbr.rel (%p1154_p10) target bundleno = 592 (0x250), region = 40  ;;  %s629_s16 = sshll.u32 (!%p1154_p10), %s1070_s15, 4 }
  0x4e   : > { %s232_s23 = scalar_lea.sflag (!%p1154_p10), [#allocation3], %s1070_s15  ;;  %s1076_s27 = scalar_lea.vmem (!%p1154_p10), [#allocation2], %s629_s16 }
  0x52   : > { %886 = dma.done.wait (%p1155_p4), %s232_s23, 256  }
  0x53   : > { %888 = vsyncadd (%p1155_p4), %s232_s23, 4294967040  ;;  %p1156_p8 = scmp.eq.s32.totalorder %s973_s22, 0 }
  0x55   : > { %890 = dma.done.wait (%p1156_p8), [#allocation6], 8192   ;;  %p1157_p7 = pmov %p1156_p8 }
  0x56   : > { %v303_v0 = vld [vmem:[#allocation5 + $0xf8] sm:$0xff]  ;;  %v302_v2 = vld [vmem:[#allocation5 + $0xf0] sm:$0xff]  ;;  %v301_v4 = vld [vmem:[#allocation5 + $0xe8] sm:$0xff]  ;;  %v920_v57 = vmov 0.0   ;;  %s643_s13 = sshll.u32 %s973_s22, 8  ;;  %s269_s14 = scalar_lea.vmem [#allocation8], %s629_s16 }
  0x57   : > { %892 = vsyncadd (%p1157_p7), [#allocation6], 4294959104  ;;  %v287_v1 = vld [vmem:[#allocation5 + $0x78] sm:$0xff]  ;;  %644 = vmatprep.subr.mxu0 %v303_v0  ;;  %v286_v3 = vld [vmem:[#allocation5 + $0x70] sm:$0xff]  ;;  %495 = vmatprep.mubr.f32.mxu1 %v920_v57  ;;  %s531_s6 = sshll.u32 %s269_s14, 4  ;;  %s1100_s29 = scalar_lea.hbm %s1142_s5, %s643_s13  ;;  %s532_s6 = int_to_ptr.vmem [resolvable:$true] %s531_s6 }
  0x58   : > { %645 = vmatpush3.msra.mxu0 %v287_v1  ;;  %v285_v5 = vld [vmem:[#allocation5 + $0x68] sm:$0xff]  ;;  %v300_v6 = vld [vmem:[#allocation5 + $0xe0] sm:$0xff]  ;;  %v299_v8 = vld [vmem:[#allocation5 + $0xd8] sm:$0xff]  ;;  %s517_s9 = scalar_lea.sflag [#allocation4], %s1070_s15  ;;  %s843_s11 = scalar_lea.vmem %s532_s6, 256 }
  0x59   : > { %646 = vmatprep.subr.mxu0 %v302_v2  ;;  %v284_v7 = vld [vmem:[#allocation5 + $0x60] sm:$0xff]  ;;  %v283_v9 = vld [vmem:[#allocation5 + $0x58] sm:$0xff]  ;;  %v298_v10 = vld [vmem:[#allocation5 + $0xd0] sm:$0xff]  ;;  %p844_p11 = scmp.ne.s32.totalorder %s532_s6, %s843_s11  ;;  %p1158_p0 = scmp.ne.s32.totalorder %s1152_s30, 0 }
  0x5a   : > { %647 = vmatpush3.msra.mxu0 %v286_v3  ;;  %v282_v11 = vld [vmem:[#allocation5 + $0x50] sm:$0xff]  ;;  %v297_v12 = vld [vmem:[#allocation5 + $0xc8] sm:$0xff]  ;;  %v296_v15 = vld [vmem:[#allocation5 + $0xc0] sm:$0xff]  ;;  %s921_s22 = smov [#allocation8]  }
  0x5b   : > { %648 = vmatprep.subr.mxu0 %v301_v4  ;;  %v271_v13 = vld [vmem:[%s1076_s27 + $0x8] sm:$0xff]  ;;  %v280_v16 = vld [vmem:[#allocation5 + $0x40] sm:$0xff]  ;;  %v294_v19 = vld [vmem:[#allocation5 + $0xb0] sm:$0xff]  ;;  %p845_p1 = pnand %p844_p11, %p1158_p0  ;;  %s847_s23 = sshll.u32 %s921_s22, 4  ;;  %s848_s23 = int_to_ptr.vmem [resolvable:$false] %s847_s23 }
  0x5c   : > { %649 = vmatpush3.msra.mxu0 %v285_v5  ;;  %v281_v14 = vld [vmem:[#allocation5 + $0x48] sm:$0xff]  ;;  %375 = vmatprep.mubr.f32.mxu0 %v271_v13  ;;  %v295_v17 = vld [vmem:[#allocation5 + $0xb8] sm:$0xff]  ;;  %v278_v20 = vld [vmem:[#allocation5 + $0x30] sm:$0xff]  ;;  %s849_s16 = scalar_lea.vmem %s848_s23, 512  ;;  %p850_p6 = scmp.lt.s32.totalorder %s532_s6, %s848_s23 }
  0x5d   : > { %650 = vmatprep.subr.mxu0 %v300_v6  ;;  %v279_v18 = vld [vmem:[#allocation5 + $0x38] sm:$0xff]  ;;  %v293_v21 = vld [vmem:[#allocation5 + $0xa8] sm:$0xff]  ;;  %v292_v23 = vld [vmem:[#allocation5 + $0xa0] sm:$0xff]  ;;  %p846_p2 = pneg %p845_p1  ;;  %p851_p12 = scmp.lt.s32.totalorder %s849_s16, %s843_s11 }
  0x5e   : > { %651 = vmatpush3.msra.mxu0 %v284_v7  ;;  %v277_v22 = vld [vmem:[#allocation5 + $0x28] sm:$0xff]  ;;  %v276_v24 = vld [vmem:[#allocation5 + $0x20] sm:$0xff]  ;;  %v291_v25 = vld [vmem:[#allocation5 + $0x98] sm:$0xff] }
  0x5f   : > { %652 = vmatprep.subr.mxu0 %v299_v8  ;;  %v275_v26 = vld [vmem:[#allocation5 + $0x18] sm:$0xff]  ;;  %v290_v27 = vld [vmem:[#allocation5 + $0x90] sm:$0xff]  ;;  %v289_v29 = vld [vmem:[#allocation5 + $0x88] sm:$0xff]  ;;  %p852_p3 = por %p851_p12, %p850_p6 }
  0x60   : > { %653 = vmatpush3.msra.mxu0 %v283_v9  ;;  %v274_v28 = vld [vmem:[#allocation5 + $0x10] sm:$0xff]  ;;  %v273_v30 = vld [vmem:[#allocation5 + $0x8] sm:$0xff]  ;;  %v288_v31 = vld [vmem:[#allocation5 + $0x80] sm:$0xff] }
  0x61   : > { %654 = vmatprep.subr.mxu0 %v298_v10  ;;  %v272_v32 = vld [vmem:[#allocation5] sm:$0xff]  ;;  %v418_v34 = vld [vmem:[#allocation7 + $0xf8] sm:$0xff]  ;;  %v417_v35 = vld [vmem:[#allocation7 + $0xf0] sm:$0xff]  ;;  %p853_p9 = pnand %p852_p3, %p846_p2 }
  0x62   : > { %655 = vmatpush3.msra.mxu0 %v282_v11  ;;  %v270_v33 = vld [vmem:[%s1076_s27] sm:$0xff]  ;;  %431 = vmatprep.subr.mxu1 %v418_v34  ;;  %v416_v36 = vld [vmem:[#allocation7 + $0xe8] sm:$0xff]  ;;  %v414_v38 = vld [vmem:[#allocation7 + $0xd8] sm:$0xff] }
  0x63   : > { %656 = vmatprep.subr.mxu0 %v297_v12  ;;  %432 = vmatpush1.msra.mxu1 %v417_v35  ;;  %v415_v37 = vld [vmem:[#allocation7 + $0xe0] sm:$0xff]  ;;  %v413_v39 = vld [vmem:[#allocation7 + $0xd0] sm:$0xff]  ;;  %v412_v40 = vld [vmem:[#allocation7 + $0xc8] sm:$0xff]  ;;  %v421_v12 = vlaneseq }
  0x64   : > { %657 = vmatpush3.msra.mxu0 %v281_v14  ;;  %433 = vmatprep.subr.mxu1 %v416_v36  ;;  %v411_v41 = vld [vmem:[#allocation7 + $0xc0] sm:$0xff]  ;;  %v410_v42 = vld [vmem:[#allocation7 + $0xb8] sm:$0xff]  ;;  %v409_v43 = vld [vmem:[#allocation7 + $0xb0] sm:$0xff] }
  0x65   : > { %658 = vmatprep.subr.mxu0 %v296_v15  ;;  %434 = vmatpush1.msra.mxu1 %v415_v37  ;;  %v408_v44 = vld [vmem:[#allocation7 + $0xa8] sm:$0xff]  ;;  %v407_v45 = vld [vmem:[#allocation7 + $0xa0] sm:$0xff]  ;;  %v406_v46 = vld [vmem:[#allocation7 + $0x98] sm:$0xff]  ;;  %v422_v13 = vshrl.u32 %v421_v12, 7 }
  0x66   : > { %659 = vmatpush3.msra.mxu0 %v280_v16  ;;  %435 = vmatprep.subr.mxu1 %v414_v38  ;;  %v405_v47 = vld [vmem:[#allocation7 + $0x90] sm:$0xff]  ;;  %v404_v48 = vld [vmem:[#allocation7 + $0x88] sm:$0xff]  ;;  %v403_v49 = vld [vmem:[#allocation7 + $0x80] sm:$0xff] }
  0x67   : > { %660 = vmatprep.subr.mxu0 %v295_v17  ;;  %436 = vmatpush1.msra.mxu1 %v413_v39  ;;  %v402_v50 = vld [vmem:[#allocation7 + $0x78] sm:$0xff]  ;;  %v401_v51 = vld [vmem:[#allocation7 + $0x70] sm:$0xff]  ;;  %v400_v52 = vld [vmem:[#allocation7 + $0x68] sm:$0xff]  ;;  %v423_v14 = vsub.s32 0, %v422_v13  ;;  %v427_v16 = vsub.s32 1, %v422_v13 }
  0x68   : > { %661 = vmatpush3.msra.mxu0 %v279_v18  ;;  %437 = vmatprep.subr.mxu1 %v412_v40  ;;  %v399_v53 = vld [vmem:[#allocation7 + $0x60] sm:$0xff]  ;;  %v398_v54 = vld [vmem:[#allocation7 + $0x58] sm:$0xff]  ;;  %v397_v55 = vld [vmem:[#allocation7 + $0x50] sm:$0xff] }
  0x69   : > { %662 = vmatprep.subr.mxu0 %v294_v19  ;;  %438 = vmatpush1.msra.mxu1 %v411_v41  ;;  %v396_v56 = vld [vmem:[#allocation7 + $0x48] sm:$0xff]  ;;  %v395_v58 = vld [vmem:[#allocation7 + $0x40] sm:$0xff]  ;;  %v394_v59 = vld [vmem:[#allocation7 + $0x38] sm:$0xff] }
  0x6a   : > { %663 = vmatpush3.msra.mxu0 %v278_v20  ;;  %439 = vmatprep.subr.mxu1 %v410_v42  ;;  %v393_v60 = vld [vmem:[#allocation7 + $0x30] sm:$0xff]  ;;  %v392_v61 = vld [vmem:[#allocation7 + $0x28] sm:$0xff]  ;;  %v391_v62 = vld [vmem:[#allocation7 + $0x20] sm:$0xff] }
  0x6b   : > { %664 = vmatprep.subr.mxu0 %v293_v21  ;;  %440 = vmatpush1.msra.mxu1 %v409_v43  ;;  %v390_v63 = vld [vmem:[#allocation7 + $0x18] sm:$0xff]  ;;  %v389_v0 = vld [vmem:[#allocation7 + $0x10] sm:$0xff]  ;;  %v388_v1 = vld [vmem:[#allocation7 + $0x8] sm:$0xff] }
  0x6c   : > { %665 = vmatpush3.msra.mxu0 %v277_v22  ;;  %441 = vmatprep.subr.mxu1 %v408_v44  ;;  %v387_v2 = vld [vmem:[#allocation7] sm:$0xff] }
  0x6d   : > { %666 = vmatprep.subr.mxu0 %v292_v23  ;;  %442 = vmatpush1.msra.mxu1 %v407_v45  ;;  %v633_v4 = vld [vmem:[%s1139_s2] ss:$0 sm:$0xff] }
  0x6e   : > { %667 = vmatpush3.msra.mxu0 %v276_v24  ;;  %443 = vmatprep.subr.mxu1 %v406_v46  ;;  %v419_v15 = vld [vmem:[%s1141_s4] sm:$0x3] }
  0x6f   : > { %668 = vmatprep.subr.mxu0 %v291_v25  ;;  %444 = vmatpush1.msra.mxu1 %v405_v47  ;;  %v424_v17 = vrot.slane %v419_v15, %v423_v14  ;;  %v428_v18 = vrot.slane %v419_v15, %v427_v16 }
  0x70   : > { %669 = vmatpush3.msra.mxu0 %v275_v26  ;;  %445 = vmatprep.subr.mxu1 %v404_v48 }
  0x71   : > { %670 = vmatprep.subr.mxu0 %v290_v27  ;;  %446 = vmatpush1.msra.mxu1 %v403_v49 }
  0x72   : > { %671 = vmatpush3.msra.mxu0 %v274_v28  ;;  %447 = vmatprep.subr.mxu1 %v402_v50 }
  0x73   : > { %672 = vmatprep.subr.mxu0 %v289_v29  ;;  %448 = vmatpush1.msra.mxu1 %v401_v51 }
  0x74   : > { %673 = vmatpush3.msra.mxu0 %v273_v30  ;;  %449 = vmatprep.subr.mxu1 %v400_v52 }
  0x75   : > { %674 = vmatprep.subr.mxu0 %v288_v31  ;;  %450 = vmatpush1.msra.mxu1 %v399_v53 }
  0x76   : > { %675 = vmatpush3.msra.mxu0 %v272_v32  ;;  %451 = vmatprep.subr.mxu1 %v398_v54 }
  0x77   : > { %376 = vmatmul.mubr.f32.vlgmr.msra.gmra.mxu0 %v270_v33  ;;  %452 = vmatpush1.msra.mxu1 %v397_v55 }
  0x78   : > { %453 = vmatprep.subr.mxu1 %v396_v56 }
  0x79   : > { %454 = vmatpush1.msra.mxu1 %v395_v58 }
  0x7a   : > { %455 = vmatprep.subr.mxu1 %v394_v59 }
  0x7b   : > { %456 = vmatpush1.msra.mxu1 %v393_v60 }
  0x7c   : > { %457 = vmatprep.subr.mxu1 %v392_v61 }
  0x7d   : > { %458 = vmatpush1.msra.mxu1 %v391_v62 }
  0x7e   : > { %459 = vmatprep.subr.mxu1 %v390_v63 }
  0x7f   : > { %460 = vmatpush1.msra.mxu1 %v389_v0 }
  0x80   : > { %461 = vmatprep.subr.mxu1 %v388_v1 }
  0x81   : > { %462 = vmatpush1.msra.mxu1 %v387_v2 }
 0x137   : > { %v676_v3 = vpop.f32.mrf.mxu0 }
 0x139   : > { %v677_v5 = vpop.f32.mrf.mxu0 }
 0x13a   : > { %v678_v6 = vadd.f32 %v677_v5, %v676_v3 }
 0x13c   : > { %v378_v7 = vadd.f32 %v678_v6, %v633_v4 }
 0x13e   : > { %v634_v8 = vmul.f32 -1.442695, %v378_v7 }
 0x140   : > { %751 = vpow2.f32 %v634_v8 }
 0x14d   : > { %v752_v9 = vpop.eup %751 }
 0x14e   : > { %v384_v10 = vadd.f32 1.0, %v752_v9 }
 0x150   : > { %753 = vrcp.f32 %v384_v10 }
 0x15d   : > { %v754_v11 = vpop.eup %753 }
 0x15e   : > { %496 = vmatmul.mubr.f32.vlgmr.msra.gmra.mxu1 %v754_v11 }
 0x21e   : > { %v497_v19 = vpop.f32.mrf.mxu1 }
 0x21f   : > { %v498_v20 = vadd.f32 %v497_v19, %v424_v17 }
 0x220   : > { %v499_v21 = vpop.f32.mrf.mxu1 }
 0x221   : > { %v635_v22 = vmul.f32 -1.442695, %v498_v20  ;;  %v500_v23 = vadd.f32 %v499_v21, %v428_v18 }
 0x223   : > { %755 = vpow2.f32 %v635_v22  ;;  %v636_v24 = vmul.f32 -1.442695, %v500_v23 }
 0x225   : > { %757 = vpow2.f32 %v636_v24 }
 0x230   : > { %v756_v25 = vpop.eup %755 }
 0x231   : > { %v508_v26 = vadd.f32 1.0, %v756_v25 }
 0x232   : > { %v758_v27 = vpop.eup %757 }
 0x233   : > { %759 = vrcp.f32 %v508_v26  ;;  %v509_v28 = vadd.f32 1.0, %v758_v27 }
 0x235   : > { %761 = vrcp.f32 %v509_v28 }
 0x240   : > { %v760_v29 = vpop.eup %759 }
 0x241   : > { %514 = vst [vmem:[%s269_s14] sm:$0xff] %v760_v29 }
 0x242   : > { %v762_v30 = vpop.eup %761 }
 0x243   : > { %515 = vst [vmem:[%s269_s14 + $0x8] sm:$0xff] %v762_v30 }
 0x244   : > { %856 = shalt.err (!%p853_p9)
}
 0x245   : > { %s857_s27 = scalar_lea.hbm %s1100_s29, 256  ;;  %s861_s26 = scalar_lea.hbm %s1142_s5, 512 }
 0x246   : > { %p858_p13 = scmp.ne.s32.totalorder %s1100_s29, %s857_s27  ;;  %p862_p4 = scmp.lt.s32.totalorder %s1100_s29, %s1142_s5 }
 0x247   : > { %p863_p8 = scmp.lt.s32.totalorder %s861_s26, %s857_s27 }
 0x248   : > { %p859_p5 = pnand %p858_p13, %p1158_p0 }
 0x249   : > { %p864_p7 = por %p863_p8, %p862_p4 }
 0x24a   : > { %p860_p10 = pneg %p859_p5 }
 0x24c   : > { %p865_p11 = pnand %p864_p7, %p860_p10 }
 0x24e   : > { %868 = shalt.err (!%p865_p11)
}
 0x24f   : > { %689 = dma.vmem_to_hbm [thread:$0]  (%p1158_p0), %s532_s6, 256, %s1100_s29, %s517_s9  }
 0x250 PF: > { %s543_s13 = sand.u32 1, %s899_s18   ;;  %p1159_p1 = scmp.ne.s32.totalorder %s1148_s25, 0 }
 0x251   : > { %p1160_p2 = scmp.ge.s32.totalorder %s911_s21, 2  ;;  %s544_s14 = scalar_lea.sflag [#allocation4], %s543_s13 }
 0x253   : > { %p703_p6 = pnand %p1160_p2, %p1159_p1 }
 0x255   : > { %p704_p12 = pneg %p703_p6 }
 0x257   : > { %894 = dma.done.wait (%p704_p12), %s544_s14, 256  }
 0x258   : > { %896 = vsyncadd (%p704_p12), %s544_s14, 4294967040  ;;  %p19_p3 = scmp.ge.s32.totalorder %s1024_s17, 4   ;;  %s1161_s18 = smov %s903_s19 }
 0x259   : > { %s1162_s19 = smov %s907_s20  ;;  %s1163_s20 = smov %s1033_s28 }
 0x25a   : > { %s1164_s21 = smov %s1024_s17  ;;  %21 = sbr.rel (!%p19_p3) target bundleno = 6 (0x6), region = 93 }
 0x25f   :  { %549 = vsyncpa [#allocation3], 1 }
 0x260   :  { %551 = vsyncpa [#allocation3 + $0x1], 1 }
 0x261   :  { %552 = vsyncpa [#allocation6], 1 }
 0x262   :  { %553 = vsyncpa [#allocation4], 1 }
 0x263   :  { %555 = vsyncpa [#allocation4 + $0x1], 1 }

</bundles_post_ra>
